<compile_context>
chip_gen: v7x
topology: tpu7x:2x2x1
jax: 0.10.0
libtpu: 0.0.40
codegen_flags: <defaults>
</compile_context>

<pallas_src>
import jax
import jax.numpy as jnp
from jax.experimental import pallas as pl
from jax.experimental.pallas import tpu as pltpu


# ----------------------------------------------------------------------------
# Pallas kernel
# ----------------------------------------------------------------------------
def _model_kernel(x_ref, w_ref, bias_ref, o_ref):
    """pred = W_blockdiag @ x + bias (bias broadcast over the lane axis).

    x_ref:    (B*C, S)    f32 VMEM, S = H*W on the lane axis (vreg-dense)
    w_ref:    (B*C, B*C)  f32 VMEM, kron(I_B, Wx) block-diagonal channel mix
    bias_ref: (B*C,)      f32 SMEM, per-row bias (CFG guidance already folded in)
    o_ref:    (B*C, S)    f32 VMEM
    """
    # Single dense channel-mix (one MXU push for all batches instead of 2B tiny ones).
    h = jnp.dot(w_ref[...], x_ref[...], preferred_element_type=jnp.float32)

    # Expand the SMEM bias scalars into an (BC, 1) column in-register.
    BC = o_ref.shape[0]
    row = jax.lax.broadcasted_iota(jnp.int32, (BC, 1), 0)
    bias_col = jnp.zeros((BC, 1), dtype=jnp.float32)
    for r in range(BC):  # BC = 8, static; 8 trivial selects on one (8,1) vreg
        bias_col = jnp.where(row == r, bias_ref[r], bias_col)

    # One dense broadcast add + one unmasked dense store.
    o_ref[...] = (h + bias_col).astype(o_ref.dtype)


def _run_model_pallas(x_flat, w_bd, bias_flat):
    """x_flat: (B*C, S), w_bd: (B*C, B*C), bias_flat: (B*C,) -> (B*C, S)."""
    BC, S = x_flat.shape
    cost = pl.CostEstimate(
        flops=2 * BC * BC * S + BC * S,
        transcendentals=0,
        bytes_accessed=(2 * BC * S + BC * BC + BC) * 4,
    )
    grid_spec = pltpu.PrefetchScalarGridSpec(
        num_scalar_prefetch=0,
        grid=(1,),  # whole working set fits VMEM -> one vreg-dense step
        in_specs=[
            pl.BlockSpec((BC, S), lambda i: (0, 0)),            # x (full block)
            pl.BlockSpec((BC, BC), lambda i: (0, 0)),           # block-diag weight
            pl.BlockSpec(memory_space=pltpu.MemorySpace.SMEM),  # bias scalars
        ],
        out_specs=pl.BlockSpec((BC, S), lambda i: (0, 0)),
    )
    return pl.pallas_call(
        _model_kernel,
        out_shape=jax.ShapeDtypeStruct((BC, S), jnp.float32),
        grid_spec=grid_spec,
        compiler_params=pltpu.CompilerParams(
            # TODO(synk): switch to ("parallel", ...) once S is tiled into a grid
            # so v7x's 2 TensorCores both get work.
            dimension_semantics=("arbitrary",),
            vmem_limit_bytes=8 * 1024 * 1024,
        ),
        cost_estimate=cost,
    )(x_flat, w_bd, bias_flat)


# ----------------------------------------------------------------------------
# CFGuidance forward (glue in plain JAX, hot path in the single Pallas kernel)
# ----------------------------------------------------------------------------
def cfguidance_forward(
    params,
    uncond_emb,                # dict: key -> (1, E) learned null embedding
    x_nchw,                    # (B, C, H, W)  -- PyTorch NCHW convention (kept native)
    timestep,                  # (B,)
    conditional_inputs=None,   # dict: key -> (B, E)
    *,
    guidance=0.0,
    p=0.1,
    training=False,
    rng=None,
):
    B, C, H, W = x_nchw.shape
    S = H * W
    BC = B * C
    x_flat = x_nchw.reshape(BC, S)                       # free view; H*W on the lane axis
    w_bd = jnp.kron(jnp.eye(B, dtype=jnp.float32), params["wx"])  # (BC, BC), 64 floats

    cond = {} if conditional_inputs is None else {
        k: v for k, v in conditional_inputs.items() if k in uncond_emb
    }
    # TODO(synk): "other_inputs" (keys not in dim_cond) are not consumed by the
    # synthetic inner model, so they are dropped rather than forwarded.

    key = "text"  # single conditional in this synthetic setup
    uncond = uncond_emb[key]           # (1, E)
    E = uncond.shape[-1]

    tbias = timestep.astype(jnp.float32)[:, None] * params["wt"][0]  # (B, C)

    def _bias(emb):  # (B, E) -> (B, C); tiny, precomputed outside the kernel
        return tbias + emb @ params["wc"]

    if training:
        # dropout_func: where(rand(b,1,...) < p, uncond, cond)
        assert rng is not None
        if key in cond:
            mask = jax.random.uniform(rng, (B, 1)) < p
            emb = jnp.where(mask, jnp.broadcast_to(uncond, cond[key].shape), cond[key])
        else:
            emb = jnp.broadcast_to(uncond, (B, E))
        bias = _bias(emb)
    elif guidance == 0 or not cond:
        emb = cond[key] if key in cond else jnp.broadcast_to(uncond, (B, E))
        bias = _bias(emb)
    else:
        # Classifier-free guidance, folded algebraically into the 8-element bias:
        # (1+g)*(h + bc) - g*(h + bu) == h + (1+g)*bc - g*bu   (h is shared)
        bc = _bias(cond[key])
        bu = _bias(jnp.broadcast_to(uncond, cond[key].shape))
        bias = (1.0 + guidance) * bc - guidance * bu
        # TODO(synk): variance_value chunking not exercised; the synthetic inner
        # model predicts the mean only (variance_value is None).

    pred = _run_model_pallas(x_flat, w_bd, bias.reshape(BC).astype(jnp.float32))
    return pred.reshape(B, C, H, W)  # free view back to NCHW


# ----------------------------------------------------------------------------
# Pure-JAX reference for verification
# ----------------------------------------------------------------------------
def _ref_model(x_nchw, timestep, emb, params):
    h = jnp.einsum("cd,bdhw->bchw", params["wx"], x_nchw)
    bias = timestep.astype(jnp.float32)[:, None] * params["wt"][0] + emb @ params["wc"]
    return h + bias[:, :, None, None]


def _ref_forward(params, uncond_emb, x_nchw, timestep, cond, guidance):
    B = x_nchw.shape[0]
    key = "text"
    uncond = uncond_emb[key]
    if guidance == 0 or not cond:
        emb = cond[key] if cond else jnp.broadcast_to(uncond, (B, uncond.shape[-1]))
        return _ref_model(x_nchw, timestep, emb, params)
    # Faithful to the torch module: run on the duplicated batch, then combine.
    emb2 = jnp.concatenate([cond[key], jnp.broadcast_to(uncond, cond[key].shape)], axis=0)
    pred2 = _ref_model(jnp.concatenate([x_nchw, x_nchw], 0),
                       jnp.concatenate([timestep, timestep], 0), emb2, params)
    return (1.0 + guidance) * pred2[:B] - guidance * pred2[B:]


# ----------------------------------------------------------------------------
if __name__ == "__main__":
    B, C, H, W, E = 2, 4, 16, 16, 32
    guidance = 2.0

    root = jax.random.PRNGKey(0)
    k_x, k_t, k_c, k_wx, k_wt, k_wc, k_null = jax.random.split(root, 7)

    # Deterministic synthetic "model" parameters (stand-in for self.model).
    params = {
        "wx": jax.random.normal(k_wx, (C, C), jnp.float32) * 0.2,
        "wt": jax.random.normal(k_wt, (1, C), jnp.float32) * 0.05,
        "wc": jax.random.normal(k_wc, (E, C), jnp.float32) * 0.1,
    }
    # learn_null_emb=True -> torch.rand init of shape (1, dim_cond["text"]).
    uncond_emb = {"text": jax.random.uniform(k_null, (1, E), jnp.float32)}

    # Inputs.
    x = jax.random.normal(k_x, (B, C, H, W), jnp.float32)
    timestep = jax.random.randint(k_t, (B,), 0, 1000)
    cond_inputs = {"text": jax.random.normal(k_c, (B, E), jnp.float32)}

    # 1) Eval path with guidance > 0 (CFG folded into the per-row bias).
    out = jax.block_until_ready(
        cfguidance_forward(params, uncond_emb, x, timestep, cond_inputs,
                           guidance=guidance, training=False))
    ref = _ref_forward(params, uncond_emb, x, timestep, cond_inputs, guidance)
    assert out.shape == (B, C, H, W)
    assert jnp.allclose(out, ref, atol=1e-4, rtol=1e-4), "mismatch vs reference (CFG)"

    # 2) Eval path with guidance == 0 (same single kernel, plain bias).
    out0 = jax.block_until_ready(
        cfguidance_forward(params, uncond_emb, x, timestep, cond_inputs,
                           guidance=0.0, training=False))
    ref0 = _ref_forward(params, uncond_emb, x, timestep, cond_inputs, 0.0)
    assert jnp.allclose(out0, ref0, atol=1e-4, rtol=1e-4), "mismatch vs reference (g=0)"

    # 3) Training path (condition dropout), same single kernel.
    rng = jax.random.PRNGKey(123)
    out_tr = jax.block_until_ready(
        cfguidance_forward(params, uncond_emb, x, timestep, cond_inputs,
                           guidance=guidance, p=0.1, training=True, rng=rng))
    mask = jax.random.uniform(rng, (B, 1)) < 0.1
    emb_tr = jnp.where(mask,
                       jnp.broadcast_to(uncond_emb["text"], cond_inputs["text"].shape),
                       cond_inputs["text"])
    ref_tr = _ref_model(x, timestep, emb_tr, params)
    assert jnp.allclose(out_tr, ref_tr, atol=1e-4, rtol=1e-4), "mismatch vs reference (train)"

    print("KERNEL_OK")
</pallas_src>

<mosaic_0001>
module attributes {stable_mosaic.version = 11 : i64} {
  func.func @_model_kernel(%arg0: i32, %arg1: memref<8x256xf32, #tpu.memory_space<vmem>>, %arg2: memref<8x8xf32, #tpu.memory_space<vmem>>, %arg3: memref<8xf32, #tpu.memory_space<smem>>, %arg4: memref<8x256xf32, #tpu.memory_space<vmem>>) attributes {dimension_semantics = [#tpu.dimension_semantics<arbitrary>], iteration_bounds = array<i64: 1>, scalar_prefetch = 0 : i64, scratch_operands = 0 : i64, tpu.core_type = #tpu.core_type<tc>, window_params = [{pipeline_mode = #tpu.pipeline_mode<synchronous>, transform_indices = @transform_0, window_bounds = array<i64: 8, 256>}, {pipeline_mode = #tpu.pipeline_mode<synchronous>, transform_indices = @transform_1, window_bounds = array<i64: 8, 8>}, {transform_indices = @transform_2, window_bounds = array<i64: 8>}, {pipeline_mode = #tpu.pipeline_mode<synchronous>, transform_indices = @transform_3, window_bounds = array<i64: 8, 256>}]} {
    %c0 = arith.constant 0 : index
    %c0_0 = arith.constant 0 : index
    %0 = vector.load %arg2[%c0, %c0_0] : memref<8x8xf32, #tpu.memory_space<vmem>>, vector<8x8xf32>
    %c0_1 = arith.constant 0 : index
    %c0_2 = arith.constant 0 : index
    %1 = vector.load %arg1[%c0_1, %c0_2] : memref<8x256xf32, #tpu.memory_space<vmem>>, vector<8x256xf32>
    %cst = arith.constant dense<0.000000e+00> : vector<8x256xf32>
    %2 = tpu.matmul %0, %1, %cst {dimension_numbers = #tpu.dot_dimension_numbers<[1], [0], [0], [1], [0, 0, 1, 1], [], []>} : vector<8x8xf32>, vector<8x256xf32>, vector<8x256xf32> -> vector<8x256xf32>
    %3 = tpu.iota {dimensions = array<i32: 0>} : vector<8x1xi32>
    %cst_3 = arith.constant 0.000000e+00 : f32
    %4 = vector.broadcast %cst_3 : f32 to vector<8x1xf32>
    %c0_i32 = arith.constant 0 : i32
    %5 = vector.broadcast %c0_i32 : i32 to vector<8x1xi32>
    %6 = arith.cmpi eq, %3, %5 : vector<8x1xi32>
    %c0_4 = arith.constant 0 : index
    %7 = memref.load %arg3[%c0_4] : memref<8xf32, #tpu.memory_space<smem>>
    %8 = vector.broadcast %7 : f32 to vector<8x1xf32>
    %9 = arith.select %6, %8, %4 : vector<8x1xi1>, vector<8x1xf32>
    %c1_i32 = arith.constant 1 : i32
    %10 = vector.broadcast %c1_i32 : i32 to vector<8x1xi32>
    %11 = arith.cmpi eq, %3, %10 : vector<8x1xi32>
    %c1 = arith.constant 1 : index
    %12 = memref.load %arg3[%c1] : memref<8xf32, #tpu.memory_space<smem>>
    %13 = vector.broadcast %12 : f32 to vector<8x1xf32>
    %14 = arith.select %11, %13, %9 : vector<8x1xi1>, vector<8x1xf32>
    %c2_i32 = arith.constant 2 : i32
    %15 = vector.broadcast %c2_i32 : i32 to vector<8x1xi32>
    %16 = arith.cmpi eq, %3, %15 : vector<8x1xi32>
    %c2 = arith.constant 2 : index
    %17 = memref.load %arg3[%c2] : memref<8xf32, #tpu.memory_space<smem>>
    %18 = vector.broadcast %17 : f32 to vector<8x1xf32>
    %19 = arith.select %16, %18, %14 : vector<8x1xi1>, vector<8x1xf32>
    %c3_i32 = arith.constant 3 : i32
    %20 = vector.broadcast %c3_i32 : i32 to vector<8x1xi32>
    %21 = arith.cmpi eq, %3, %20 : vector<8x1xi32>
    %c3 = arith.constant 3 : index
    %22 = memref.load %arg3[%c3] : memref<8xf32, #tpu.memory_space<smem>>
    %23 = vector.broadcast %22 : f32 to vector<8x1xf32>
    %24 = arith.select %21, %23, %19 : vector<8x1xi1>, vector<8x1xf32>
    %c4_i32 = arith.constant 4 : i32
    %25 = vector.broadcast %c4_i32 : i32 to vector<8x1xi32>
    %26 = arith.cmpi eq, %3, %25 : vector<8x1xi32>
    %c4 = arith.constant 4 : index
    %27 = memref.load %arg3[%c4] : memref<8xf32, #tpu.memory_space<smem>>
    %28 = vector.broadcast %27 : f32 to vector<8x1xf32>
    %29 = arith.select %26, %28, %24 : vector<8x1xi1>, vector<8x1xf32>
    %c5_i32 = arith.constant 5 : i32
    %30 = vector.broadcast %c5_i32 : i32 to vector<8x1xi32>
    %31 = arith.cmpi eq, %3, %30 : vector<8x1xi32>
    %c5 = arith.constant 5 : index
    %32 = memref.load %arg3[%c5] : memref<8xf32, #tpu.memory_space<smem>>
    %33 = vector.broadcast %32 : f32 to vector<8x1xf32>
    %34 = arith.select %31, %33, %29 : vector<8x1xi1>, vector<8x1xf32>
    %c6_i32 = arith.constant 6 : i32
    %35 = vector.broadcast %c6_i32 : i32 to vector<8x1xi32>
    %36 = arith.cmpi eq, %3, %35 : vector<8x1xi32>
    %c6 = arith.constant 6 : index
    %37 = memref.load %arg3[%c6] : memref<8xf32, #tpu.memory_space<smem>>
    %38 = vector.broadcast %37 : f32 to vector<8x1xf32>
    %39 = arith.select %36, %38, %34 : vector<8x1xi1>, vector<8x1xf32>
    %c7_i32 = arith.constant 7 : i32
    %40 = vector.broadcast %c7_i32 : i32 to vector<8x1xi32>
    %41 = arith.cmpi eq, %3, %40 : vector<8x1xi32>
    %c7 = arith.constant 7 : index
    %42 = memref.load %arg3[%c7] : memref<8xf32, #tpu.memory_space<smem>>
    %43 = vector.broadcast %42 : f32 to vector<8x1xf32>
    %44 = arith.select %41, %43, %39 : vector<8x1xi1>, vector<8x1xf32>
    %45 = vector.broadcast %44 : vector<8x1xf32> to vector<8x256xf32>
    %46 = arith.addf %2, %45 : vector<8x256xf32>
    %c0_5 = arith.constant 0 : index
    %c0_6 = arith.constant 0 : index
    %47 = vector.load %arg4[%c0_5, %c0_6] : memref<8x256xf32, #tpu.memory_space<vmem>>, vector<8x256xf32>
    tpu.vector_store %arg4[%c0_5, %c0_6], %46 {strides = array<i32>} : memref<8x256xf32, #tpu.memory_space<vmem>>, vector<8x256xf32>,
    return
  }
  func.func @transform_0(%arg0: i32) -> (i32, i32) {
    %c0_i32 = arith.constant 0 : i32
    %c0_i32_0 = arith.constant 0 : i32
    %c0_i32_1 = arith.constant 0 : i32
    return %c0_i32, %c0_i32_0 : i32, i32
  }
  func.func @transform_1(%arg0: i32) -> (i32, i32) {
    %c0_i32 = arith.constant 0 : i32
    %c0_i32_0 = arith.constant 0 : i32
    %c0_i32_1 = arith.constant 0 : i32
    return %c0_i32, %c0_i32_0 : i32, i32
  }
  func.func @transform_2(%arg0: i32) -> i32 {
    %c0_i32 = arith.constant 0 : i32
    %c0_i32_0 = arith.constant 0 : i32
    return %c0_i32 : i32
  }
  func.func @transform_3(%arg0: i32) -> (i32, i32) {
    %c0_i32 = arith.constant 0 : i32
    %c0_i32_0 = arith.constant 0 : i32
    %c0_i32_1 = arith.constant 0 : i32
    return %c0_i32, %c0_i32_0 : i32, i32
  }
}

</mosaic_0001>

<bundles_post_ra>
// kernel: tpu_custom_call.1
= control target key start
LH: loop header
LB: loop body
LE: loop exit
PB: predicated region body
PF: predicated region fallthrough
CT: control target
= control target key end

     0   :  { %8 = vsyncpa [#allocation3], 0  ;;  %s346_s0 = inlined_call_operand.hbm [shape: f32[8,256], index: 0, kind: input, shape index: {}]   ;;  %s347_s1 = inlined_call_operand.hbm [shape: f32[8,8], index: 1, kind: input, shape index: {}]   ;;  %s348_s2 = inlined_call_operand.vmem [shape: f32[8], index: 2, kind: input, shape index: {}]   ;;  %s349_s3 = inlined_call_operand.hbm [shape: f32[8,256], index: 3, kind: output, shape index: {}]  }
   0x1   :  { %9 = vsyncpa [#allocation7], 0 }
   0x2   :  { %10 = vsyncpa [#allocation5], 0 }
   0x3   :  { %11 = vsyncpa [#allocation4], 0  ;;  %s282_s12 = smov [#allocation2]   ;;  %s283_s14 = smov [#allocation6]  }
   0x4   :  { %s18_s13 = sshll.u32 %s282_s12, 4  ;;  %s28_s15 = sshll.u32 %s283_s14, 4  ;;  %s19_s13 = int_to_ptr.vmem [resolvable:$true] %s18_s13  ;;  %s29_s15 = int_to_ptr.vmem [resolvable:$true] %s28_s15 }
   0x5   :  { %s196_s18 = scalar_lea.hbm %s346_s0, 256 }
   0x6   :  { %p197_p0 = scmp.ne.s32.totalorder %s346_s0, %s196_s18  ;;  %p200_p1 = scmp.lt.u32.totalorder %s196_s18, %s346_s0 }
   0x8   :  { %p202_p2 = pnand %p200_p1, %p197_p0 }
   0xa   :  { %205 = shalt.err (!%p202_p2)
}
   0xb   :  { %s206_s23 = scalar_lea.vmem %s19_s13, 256  ;;  %p211_p4 = scmp.lt.s32.totalorder %s19_s13, %s19_s13 }
   0xc   :  { %p207_p3 = scmp.ne.s32.totalorder %s19_s13, %s206_s23  ;;  %p212_p5 = scmp.lt.s32.totalorder %s206_s23, %s206_s23 }
   0xe   :  { %p213_p6 = por %p212_p5, %p211_p4 }
  0x10   :  { %p214_p7 = pnand %p213_p6, %p207_p3 }
  0x12   :  { %217 = shalt.err (!%p214_p7)
}
  0x13   :  { %21 = dma.hbm_to_vmem [thread:$0]  %s346_s0, 256, %s19_s13, [#allocation3]  }
  0x14   :  { %s218_s28 = scalar_lea.hbm %s347_s1, 128 }
  0x15   :  { %p219_p8 = scmp.ne.s32.totalorder %s347_s1, %s218_s28  ;;  %p222_p9 = scmp.lt.u32.totalorder %s218_s28, %s347_s1 }
  0x17   :  { %p224_p10 = pnand %p222_p9, %p219_p8 }
  0x19   :  { %227 = shalt.err (!%p224_p10)
}
  0x1a   :  { %s228_s6 = scalar_lea.vmem %s29_s15, 128  ;;  %p233_p12 = scmp.lt.s32.totalorder %s29_s15, %s29_s15 }
  0x1b   :  { %p229_p11 = scmp.ne.s32.totalorder %s29_s15, %s228_s6  ;;  %p234_p13 = scmp.lt.s32.totalorder %s228_s6, %s228_s6 }
  0x1d   :  { %p235_p0 = por %p234_p13, %p233_p12 }
  0x1f   :  { %p236_p1 = pnand %p235_p0, %p229_p11 }
  0x21   :  { %239 = shalt.err (!%p236_p1)
}
  0x22   :  { %31 = dma.hbm_to_vmem [thread:$0]  %s347_s1, 128, %s29_s15, [#allocation7]  }
  0x23   :  { %s38_s10 = sshll.u32 %s348_s2, 4  ;;  %s39_s10 = int_to_ptr.vmem [resolvable:$true] %s38_s10 }
  0x24   :  { %s240_s11 = scalar_lea.vmem %s39_s10, 16  ;;  %p245_p3 = scmp.lt.s32.totalorder %s39_s10, %s39_s10 }
  0x25   :  { %p241_p2 = scmp.ne.s32.totalorder %s39_s10, %s240_s11  ;;  %p246_p4 = scmp.lt.s32.totalorder %s240_s11, %s240_s11 }
  0x27   :  { %p247_p5 = por %p246_p4, %p245_p3 }
  0x29   :  { %p248_p6 = pnand %p247_p5, %p241_p2 }
  0x2b   :  { %251 = shalt.err (!%p248_p6)
}
  0x2c   :  { %s284_s12 = smov [#allocation8]  }
  0x2d   :  { %41 = dma.vmem_to_smem %s39_s10, 16, %s284_s12, [#allocation5]  }
  0x2e   :  { %274 = dma.done.wait [#allocation3], 256  }
  0x2f   :  { %275 = vsyncadd [#allocation3], 4294967040 }
  0x30   :  { %276 = dma.done.wait [#allocation7], 128  }
  0x31   :  { %277 = vsyncadd [#allocation7], 4294967168 }
  0x32   :  { %278 = dma.done.wait [#allocation5], 16  }
  0x33   :  { %279 = vsyncadd [#allocation5], 4294967280 }
  0x34   :  { %51 = sfence }
  0x35   :  { %v54_v0 = vld [vmem:[#allocation2 + $0x8] sm:$0xff]  ;;  %v53_v1 = vld [vmem:[#allocation2] sm:$0xff]  ;;  %v52_v2 = vld [vmem:[#allocation6] sm:$0xff]  ;;  %vm89_vm0 = vcmask 64512   ;;  %v285_v3 = vmov 0.0   ;;  %v55_v4 = vlaneseq  ;;  %s58_s1 = sld [smem:[#allocation8]] }
  0x36   :  { %93 = vmatprep.subr.mxu0 %v54_v0  ;;  %157 = vmatprep.mubr.f32.mxu0 %v285_v3  ;;  %s183_s2 = sld [smem:[#allocation8 + $0x1]]  ;;  %s184_s13 = sld [smem:[#allocation8 + $0x2]] }
  0x37   :  { %94 = vmatpush1.msra.mxu0 %v53_v1  ;;  %v56_v5 = vshrl.u32 %v55_v4, 7  ;;  %s185_s14 = sld [smem:[#allocation8 + $0x3]]  ;;  %s186_s15 = sld [smem:[#allocation8 + $0x4]] }
  0x38   :  { %190 = vmatmul.mubr.msk.f32.vlgmr.msra.gmra.mrb[0].mxu0 %vm89_vm0, %v52_v2  ;;  %s187_s16 = sld [smem:[#allocation8 + $0x5]]  ;;  %s188_s17 = sld [smem:[#allocation8 + $0x6]] }
  0x39   :  { %vm57_vm1 = vcmp.eq.s32.totalorder %v56_v5, 0  ;;  %vm61_vm2 = vcmp.eq.s32.totalorder %v56_v5, 1  ;;  %vm65_vm3 = vcmp.eq.s32.totalorder %v56_v5, 2  ;;  %vm69_vm4 = vcmp.eq.s32.totalorder %v56_v5, 3  ;;  %s189_s18 = sld [smem:[#allocation8 + $0x7]]  ;;  %s286_s19 = smov [#allocation9]  }
  0x3a   :  { %vm73_vm5 = vcmp.eq.s32.totalorder %v56_v5, 4  ;;  %vm77_vm6 = vcmp.eq.s32.totalorder %v56_v5, 5  ;;  %vm81_vm7 = vcmp.eq.s32.totalorder %v56_v5, 6  ;;  %vm85_vm8 = vcmp.eq.s32.totalorder %v56_v5, 7  ;;  %s172_s20 = sshll.u32 %s286_s19, 4  ;;  %s173_s20 = int_to_ptr.vmem [resolvable:$true] %s172_s20 }
  0x3b   :  { %v59_v6 = vstv %s58_s1  ;;  %s252_s21 = scalar_lea.vmem %s173_s20, 256  ;;  %p257_p8 = scmp.lt.s32.totalorder %s173_s20, %s173_s20 }
  0x3c   :  { %v60_v7 = vsel %vm57_vm1, %v59_v6, 0.0  ;;  %v63_v8 = vstv %s183_s2  ;;  %v67_v10 = vstv %s184_s13  ;;  %p253_p7 = scmp.ne.s32.totalorder %s173_s20, %s252_s21  ;;  %p258_p9 = scmp.lt.s32.totalorder %s252_s21, %s252_s21 }
  0x3d   :  { %v64_v9 = vsel %vm61_vm2, %v63_v8, %v60_v7  ;;  %v71_v12 = vstv %s185_s14  ;;  %v75_v14 = vstv %s186_s15 }
  0x3e   :  { %v68_v11 = vsel %vm65_vm3, %v67_v10, %v64_v9  ;;  %v79_v16 = vstv %s187_s16  ;;  %v83_v18 = vstv %s188_s17  ;;  %p259_p10 = por %p258_p9, %p257_p8 }
  0x3f   :  { %v72_v13 = vsel %vm69_vm4, %v71_v12, %v68_v11  ;;  %v87_v20 = vstv %s189_s18 }
  0x40   :  { %v76_v15 = vsel %vm73_vm5, %v75_v14, %v72_v13  ;;  %p260_p11 = pnand %p259_p10, %p253_p7 }
  0x41   :  { %v80_v17 = vsel %vm77_vm6, %v79_v16, %v76_v15 }
  0x42   :  { %v84_v19 = vsel %vm81_vm7, %v83_v18, %v80_v17 }
  0x43   :  { %v88_v21 = vsel %vm85_vm8, %v87_v20, %v84_v19 }
 0x10b   :  { %v159_v22 = vpop.f32.mrb[0].mxu0 }
 0x10c   :  { %v160_v23 = vadd.f32 %v159_v22, %v88_v21  ;;  %v161_v24 = vpop.f32.mrb[1].mxu0 }
 0x10d   :  { %v162_v25 = vadd.f32 %v161_v24, %v88_v21 }
 0x10e   :  { %164 = vst [vmem:[#allocation9] sm:$0xff] %v160_v23 }
 0x10f   :  { %165 = vst [vmem:[#allocation9 + $0x8] sm:$0xff] %v162_v25 }
 0x110   :  { %263 = shalt.err (!%p260_p11)
}
 0x111   :  { %s264_s24 = scalar_lea.hbm %s349_s3, 256 }
 0x112   :  { %p265_p12 = scmp.ne.s32.totalorder %s349_s3, %s264_s24  ;;  %p268_p13 = scmp.lt.u32.totalorder %s264_s24, %s349_s3 }
 0x114   :  { %p270_p0 = pnand %p268_p13, %p265_p12 }
 0x116   :  { %273 = shalt.err (!%p270_p0)
}
 0x117   :  { %175 = dma.vmem_to_hbm [thread:$0]  %s173_s20, 256, %s349_s3, [#allocation4]  }
 0x118   :  { %280 = dma.done.wait [#allocation4], 256  }
 0x119   :  { %281 = vsyncadd [#allocation4], 4294967040 }
 0x11a   :  { %179 = vsyncpa [#allocation3], 1 }
 0x11b   :  { %180 = vsyncpa [#allocation7], 1 }
 0x11c   :  { %181 = vsyncpa [#allocation4], 1 }
 0x11d   :  { %182 = vsyncpa [#allocation5], 1 }

</bundles_post_ra>
